<compile_context>
chip_gen: v7x
topology: tpu7x:2x2x1
jax: 0.10.0
libtpu: 0.0.40
codegen_flags: <defaults>
</compile_context>

<pallas_src>
import functools

import jax
import jax.numpy as jnp
from jax import lax
from jax.experimental import pallas as pl
from jax.experimental.pallas import tpu as pltpu


# ---------------------------------------------------------------------------
# Trace-time weight folding.
#
# out[2r+a, 2c+b, co] = bias[co]
#   + sum_{i,q,ci} xpad[r+a+i, c+q, ci] * Wfold[a, i, q*C+ci, b*C+co]
# where xpad is the zero-padded ORIGINAL-resolution input, i in {0,1} is the
# row tap and q in {0,1,2} the column tap of the padded 3x3 window.
# ---------------------------------------------------------------------------
def _fold_subrow_weights(w_hwio):
    """Fold (3, 3, Cin, Cout) HWIO weights into (2, 2, 3*Cin, 2*Cout)."""
    f32 = jnp.float32
    w = w_hwio.astype(f32)
    # S[a, i, kh] == 1 iff 3x3 row tap kh maps to 2x2 row tap i for sub-row a.
    S = jnp.array([[[1., 0., 0.], [0., 1., 1.]],
                   [[1., 1., 0.], [0., 0., 1.]]], dtype=f32)
    # Q[b, kw, q] == 1 iff 3x3 col tap kw reads padded column c + q for sub-col b.
    Q = jnp.array([[[1., 0., 0.], [0., 1., 0.], [0., 1., 0.]],
                   [[0., 1., 0.], [0., 1., 0.], [0., 0., 1.]]], dtype=f32)
    wf = jnp.einsum("aik,blq,klcd->aiqcbd", S, Q, w)   # (2, 2, 3, Cin, 2, Cout)
    cin, cout = w_hwio.shape[2], w_hwio.shape[3]
    return wf.reshape(2, 2, 3 * cin, 2 * cout)


# ---------------------------------------------------------------------------
# Kernel: one (TH x W) row tile of the ORIGINAL image per grid step.
# ---------------------------------------------------------------------------
def _upsample_conv_kernel(x_ref, halo_ref, w_ref, b_ref, o_ref, base_ref, *,
                          TH, W, C, use_halo):
    # x_ref   : (1, TH,  W+2, C) bf16  padded-input rows [t*TH, t*TH+TH)
    #           (or (1, TH+2, W+2, C) when use_halo=False)
    # halo_ref: (1, 2,   W+2, C) bf16  padded-input rows [t*TH+TH, t*TH+TH+2)
    # w_ref   : (2, 2, 3C, 2C)   bf16  folded weights [a, i, (q,ci), (b,co)]
    # b_ref   : (1, 2C)          f32   bias tiled over (b, co)
    # o_ref   : (1, TH, 2, W, 2C)      pixel-shuffled output rows y = 2h + a
    # base_ref: (TH+2, W, 3C)    bf16  VMEM scratch im2col base
    mrows = TH if use_halo else TH + 2

    # Assemble the column-shifted base once per tile (3 shifted views along the
    # channel/lane dim); the 3 row taps below are plain windows of this buffer.
    for q in range(3):
        base_ref[0:mrows, :, q * C:(q + 1) * C] = x_ref[0, :, q:q + W, :]
        if use_halo:
            base_ref[TH:TH + 2, :, q * C:(q + 1) * C] = halo_ref[0, :, q:q + W, :]

    # Row taps p = 0, 1, 2 (shared between the two sub-rows a).
    rows = [base_ref[p:p + TH].reshape(TH * W, 3 * C) for p in range(3)]
    bias = b_ref[...]                                     # (1, 2C) f32

    for a in range(2):
        acc = jnp.dot(rows[a], w_ref[a, 0],
                      preferred_element_type=jnp.float32)
        acc = acc + jnp.dot(rows[a + 1], w_ref[a, 1],
                            preferred_element_type=jnp.float32)
        acc = acc + bias                                  # bias added once
        # (TH*W, 2C) -> (TH, W, 2C): cheap row split; b is already interleaved
        # in the lane dim, so this is the pixel-shuffled layout.
        o_ref[0, :, a, :, :] = acc.reshape(TH, W, 2 * C).astype(o_ref.dtype)


# ---------------------------------------------------------------------------
# Tile-size / VMEM-budget selection.
# ---------------------------------------------------------------------------
def _vmem_capacity_bytes():
    try:
        return int(pltpu.get_tpu_info().vmem_capacity_bytes)
    except Exception:
        return 64 * 1024 * 1024          # conservative (v7x physical VMEM)


def _working_set_bytes(TH, W, C, out_itemsize):
    in_blk = (TH + 2) * (W + 2) * C * 2            # bf16 main + halo block
    out_blk = TH * 2 * W * 2 * C * out_itemsize
    base = (TH + 2) * W * 3 * C * 2                # bf16 scratch
    acc = 2 * TH * W * 2 * C * 4                   # f32 accumulators
    wgt = 2 * (2 * 2 * 3 * C * 2 * C * 2 + 2 * C * 4)
    # 2x: input / output blocks are double-buffered by the pipeline.
    return 2 * (in_blk + out_blk) + base + acc + wgt


def _pick_tile_h(H, W, C, out_itemsize, budget):
    """Largest even divisor of H whose working set fits the budget; prefer
    >= 2 row tiles (keeps both v7x TensorCores busy even at batch 1) and
    multiples of 8 (cheap row-collapse reshapes).  None -> untiled fallback."""
    divs = [d for d in range(2, H + 1, 2) if H % d == 0]
    if not divs:
        return None
    fitting = [d for d in divs if _working_set_bytes(d, W, C, out_itemsize) <= budget]
    pool = fitting if fitting else divs[:1]
    multi = [d for d in pool if H // d >= 2] or pool
    mult8 = [d for d in multi if d % 8 == 0]
    return max(mult8) if mult8 else max(multi)


# ---------------------------------------------------------------------------
# pallas_call wrapper: returns pixel-shuffled output (N, H, 2, W, 2C) whose
# plain reshape to (N, 2H, 2W, C) is the NHWC result (pure metadata).
# ---------------------------------------------------------------------------
def _upsample_pixelshuffled(x_nhwc, w_hwio, bias, *, tile_h=None, out_dtype=None):
    N, H, W, C = x_nhwc.shape
    out_dtype = x_nhwc.dtype if out_dtype is None else out_dtype
    out_itemsize = jnp.dtype(out_dtype).itemsize

    vmem_cap = _vmem_capacity_bytes()
    vmem_limit = int(min(vmem_cap * 3 // 4, 100 * 1024 * 1024))
    budget = vmem_limit // 3

    if tile_h is None:
        TH = _pick_tile_h(H, W, C, out_itemsize, budget)
    else:
        assert H % tile_h == 0 and (tile_h % 2 == 0 or tile_h == H), (H, tile_h)
        TH = tile_h if tile_h % 2 == 0 else None
    use_halo = TH is not None
    if not use_halo:
        TH = H
    T = H // TH

    # Fold weights once at trace time (f32), then cast operands to bf16 so the
    # MXU runs at native rate with f32 accumulation.
    w_fold = _fold_subrow_weights(w_hwio).astype(jnp.bfloat16)      # (2,2,3C,2C)
    bias2 = jnp.tile(bias.astype(jnp.float32).reshape(1, C), (1, 2))  # (1, 2C)

    # Zero-pad the ORIGINAL-resolution input once (the only extra HBM copy);
    # overlapping halo'd row windows are fetched directly from it by two
    # BlockSpecs on the same array (no wrapper-side halo duplication pass).
    xp = jnp.pad(x_nhwc.astype(jnp.bfloat16),
                 ((0, 0), (1, 1), (1, 1), (0, 0)))                  # (N,H+2,W+2,C)

    if use_halo:
        x_block_h = TH
        x_index = lambda n, t: (n, t, 0, 0)
        halo_index = lambda n, t: (n, (t + 1) * (TH // 2), 0, 0)
    else:
        x_block_h = H + 2
        x_index = lambda n, t: (n, 0, 0, 0)
        halo_index = lambda n, t: (n, 0, 0, 0)

    kernel = functools.partial(_upsample_conv_kernel,
                               TH=TH, W=W, C=C, use_halo=use_halo)

    flops = 2 * 24 * C * C * N * H * W
    bytes_accessed = (xp.size * 2 + w_fold.size * 2 + bias2.size * 4
                      + N * H * 2 * W * 2 * C * out_itemsize)

    # TODO(synk): the constant weight/bias blocks are still double-buffered by
    # the default pipeline; single-buffering them would free a little VMEM for
    # very large C.
    return pl.pallas_call(
        kernel,
        out_shape=jax.ShapeDtypeStruct((N, H, 2, W, 2 * C), out_dtype),
        grid_spec=pltpu.PrefetchScalarGridSpec(
            num_scalar_prefetch=0,
            grid=(N, T),
            in_specs=[
                pl.BlockSpec((1, x_block_h, W + 2, C), x_index),
                pl.BlockSpec((1, 2, W + 2, C), halo_index),
                pl.BlockSpec((2, 2, 3 * C, 2 * C), lambda n, t: (0, 0, 0, 0)),
                pl.BlockSpec((1, 2 * C), lambda n, t: (0, 0)),
            ],
            out_specs=pl.BlockSpec((1, TH, 2, W, 2 * C),
                                   lambda n, t: (n, t, 0, 0, 0)),
            scratch_shapes=[pltpu.VMEM((TH + 2, W, 3 * C), jnp.bfloat16)],
        ),
        compiler_params=pltpu.CompilerParams(
            dimension_semantics=("parallel", "parallel"),
            vmem_limit_bytes=vmem_limit),
        cost_estimate=pl.CostEstimate(flops=flops, transcendentals=0,
                                      bytes_accessed=bytes_accessed),
    )(xp, xp, w_fold, bias2)


def upsample_forward_nhwc(x_nhwc, w_hwio, bias, *, tile_h=None):
    """NHWC-native UpSample forward: (N, H, W, C) -> (N, 2H, 2W, C)."""
    N, H, W, C = x_nhwc.shape
    out = _upsample_pixelshuffled(x_nhwc, w_hwio, bias, tile_h=tile_h)
    return out.reshape(N, 2 * H, 2 * W, C)        # pure metadata reshape


def upsample_forward(x_nchw, weight_oihw, bias, *, tile_h=None):
    """UpSample.forward with PyTorch layouts.

    x: (N, C, H, W), weight: (C_out, C_in, 3, 3) (nn.Conv2d OIHW), bias: (C,).
    Returns (N, C, 2H, 2W).
    """
    N, C, H, W = x_nchw.shape
    # TODO(synk): the NCHW<->NHWC conversions remain wrapper-side XLA
    # transposes; NHWC-native callers should use `upsample_forward_nhwc`.
    x_nhwc = jnp.transpose(x_nchw, (0, 2, 3, 1))
    w_hwio = jnp.transpose(weight_oihw, (2, 3, 1, 0))
    out_nhwc = _upsample_pixelshuffled(
        x_nhwc, w_hwio, bias, tile_h=tile_h).reshape(N, 2 * H, 2 * W, C)
    return jnp.transpose(out_nhwc, (0, 3, 1, 2))


def _reference_forward(x_nchw, weight_oihw, bias):
    """Pure-JAX f32 reference (same semantics as the PyTorch module)."""
    x = jnp.transpose(x_nchw, (0, 2, 3, 1))
    w_hwio = jnp.transpose(weight_oihw, (2, 3, 1, 0))
    x_up = jnp.repeat(jnp.repeat(x, 2, axis=1), 2, axis=2)
    out = lax.conv_general_dilated(
        x_up, w_hwio, window_strides=(1, 1), padding="SAME",
        dimension_numbers=("NHWC", "HWIO", "NHWC"),
        precision=lax.Precision.HIGHEST,
    ) + bias.reshape(1, 1, 1, -1)
    return jnp.transpose(out, (0, 3, 1, 2))


if __name__ == "__main__":
    key = jax.random.PRNGKey(0)
    N, C, H, W = 2, 4, 16, 16

    k_x, k_w, k_b = jax.random.split(key, 3)
    x = jax.random.normal(k_x, (N, C, H, W), dtype=jnp.float32)
    # Deterministic synthetic Conv2d(C, C, 3) parameters in PyTorch OIHW layout.
    fan_in = C * 3 * 3
    bound = 1.0 / jnp.sqrt(fan_in)
    weight_oihw = jax.random.uniform(
        k_w, (C, C, 3, 3), dtype=jnp.float32, minval=-bound, maxval=bound)
    bias = jax.random.uniform(
        k_b, (C,), dtype=jnp.float32, minval=-bound, maxval=bound)

    fwd = jax.jit(upsample_forward)
    out = jax.block_until_ready(fwd(x, weight_oihw, bias))

    ref = _reference_forward(x, weight_oihw, bias)
    assert out.shape == (N, C, 2 * H, 2 * W), out.shape
    # bf16 matmul operands (f32 accumulate) -> compare at bf16-level tolerance.
    max_err = float(jnp.max(jnp.abs(out - ref)))
    assert jnp.allclose(out, ref, atol=2e-2, rtol=2e-2), max_err

    print("KERNEL_OK")
</pallas_src>

<mosaic_0001>
module attributes {stable_mosaic.version = 11 : i64} {
  func.func @_upsample_conv_kernel(%arg0: i32, %arg1: i32, %arg2: memref<1x8x18x4xbf16, #tpu.memory_space<vmem>>, %arg3: memref<1x2x18x4xbf16, #tpu.memory_space<vmem>>, %arg4: memref<2x2x12x8xbf16, #tpu.memory_space<vmem>>, %arg5: memref<1x8xf32, #tpu.memory_space<vmem>>, %arg6: memref<1x8x2x16x8xf32, #tpu.memory_space<vmem>>, %arg7: memref<10x16x12xbf16, #tpu.memory_space<vmem>>) attributes {dimension_semantics = [#tpu.dimension_semantics<parallel>, #tpu.dimension_semantics<parallel>], iteration_bounds = array<i64: 2, 2>, scalar_prefetch = 0 : i64, scratch_operands = 1 : i64, tpu.core_type = #tpu.core_type<tc>, window_params = [{transform_indices = @transform_0, window_bounds = array<i64: 1, 8, 18, 4>}, {transform_indices = @transform_1, window_bounds = array<i64: 1, 2, 18, 4>}, {pipeline_mode = #tpu.pipeline_mode<synchronous>, transform_indices = @transform_2, window_bounds = array<i64: 2, 2, 12, 8>}, {pipeline_mode = #tpu.pipeline_mode<synchronous>, transform_indices = @transform_3, window_bounds = array<i64: 1, 8>}, {transform_indices = @transform_4, window_bounds = array<i64: 1, 8, 2, 16, 8>}]} {
    %c0 = arith.constant 0 : index
    %c0_0 = arith.constant 0 : index
    %c0_1 = arith.constant 0 : index
    %c0_2 = arith.constant 0 : index
    %0 = vector.load %arg2[%c0, %c0_0, %c0_1, %c0_2] : memref<1x8x18x4xbf16, #tpu.memory_space<vmem>>, vector<1x8x16x4xbf16>
    %1 = vector.shape_cast %0 : vector<1x8x16x4xbf16> to vector<8x16x4xbf16>
    %c0_3 = arith.constant 0 : index
    %c0_4 = arith.constant 0 : index
    %c0_5 = arith.constant 0 : index
    %2 = vector.load %arg7[%c0_3, %c0_4, %c0_5] : memref<10x16x12xbf16, #tpu.memory_space<vmem>>, vector<8x16x4xbf16>
    tpu.vector_store %arg7[%c0_3, %c0_4, %c0_5], %1 {strides = array<i32>} : memref<10x16x12xbf16, #tpu.memory_space<vmem>>, vector<8x16x4xbf16>,
    %c0_6 = arith.constant 0 : index
    %c0_7 = arith.constant 0 : index
    %c0_8 = arith.constant 0 : index
    %c0_9 = arith.constant 0 : index
    %3 = vector.load %arg3[%c0_6, %c0_7, %c0_8, %c0_9] : memref<1x2x18x4xbf16, #tpu.memory_space<vmem>>, vector<1x2x16x4xbf16>
    %4 = vector.shape_cast %3 : vector<1x2x16x4xbf16> to vector<2x16x4xbf16>
    %c8 = arith.constant 8 : index
    %c0_10 = arith.constant 0 : index
    %c0_11 = arith.constant 0 : index
    %5 = vector.load %arg7[%c8, %c0_10, %c0_11] : memref<10x16x12xbf16, #tpu.memory_space<vmem>>, vector<2x16x4xbf16>
    tpu.vector_store %arg7[%c8, %c0_10, %c0_11], %4 {strides = array<i32>} : memref<10x16x12xbf16, #tpu.memory_space<vmem>>, vector<2x16x4xbf16>,
    %c0_12 = arith.constant 0 : index
    %c0_13 = arith.constant 0 : index
    %c1 = arith.constant 1 : index
    %c0_14 = arith.constant 0 : index
    %6 = vector.load %arg2[%c0_12, %c0_13, %c1, %c0_14] : memref<1x8x18x4xbf16, #tpu.memory_space<vmem>>, vector<1x8x16x4xbf16>
    %7 = vector.shape_cast %6 : vector<1x8x16x4xbf16> to vector<8x16x4xbf16>
    %c0_15 = arith.constant 0 : index
    %c0_16 = arith.constant 0 : index
    %c4 = arith.constant 4 : index
    %8 = vector.load %arg7[%c0_15, %c0_16, %c4] : memref<10x16x12xbf16, #tpu.memory_space<vmem>>, vector<8x16x4xbf16>
    tpu.vector_store %arg7[%c0_15, %c0_16, %c4], %7 {strides = array<i32>} : memref<10x16x12xbf16, #tpu.memory_space<vmem>>, vector<8x16x4xbf16>,
    %c0_17 = arith.constant 0 : index
    %c0_18 = arith.constant 0 : index
    %c1_19 = arith.constant 1 : index
    %c0_20 = arith.constant 0 : index
    %9 = vector.load %arg3[%c0_17, %c0_18, %c1_19, %c0_20] : memref<1x2x18x4xbf16, #tpu.memory_space<vmem>>, vector<1x2x16x4xbf16>
    %10 = vector.shape_cast %9 : vector<1x2x16x4xbf16> to vector<2x16x4xbf16>
    %c8_21 = arith.constant 8 : index
    %c0_22 = arith.constant 0 : index
    %c4_23 = arith.constant 4 : index
    %11 = vector.load %arg7[%c8_21, %c0_22, %c4_23] : memref<10x16x12xbf16, #tpu.memory_space<vmem>>, vector<2x16x4xbf16>
    tpu.vector_store %arg7[%c8_21, %c0_22, %c4_23], %10 {strides = array<i32>} : memref<10x16x12xbf16, #tpu.memory_space<vmem>>, vector<2x16x4xbf16>,
    %c0_24 = arith.constant 0 : index
    %c0_25 = arith.constant 0 : index
    %c2 = arith.constant 2 : index
    %c0_26 = arith.constant 0 : index
    %12 = vector.load %arg2[%c0_24, %c0_25, %c2, %c0_26] : memref<1x8x18x4xbf16, #tpu.memory_space<vmem>>, vector<1x8x16x4xbf16>
    %13 = vector.shape_cast %12 : vector<1x8x16x4xbf16> to vector<8x16x4xbf16>
    %c0_27 = arith.constant 0 : index
    %c0_28 = arith.constant 0 : index
    %c8_29 = arith.constant 8 : index
    %14 = vector.load %arg7[%c0_27, %c0_28, %c8_29] : memref<10x16x12xbf16, #tpu.memory_space<vmem>>, vector<8x16x4xbf16>
    tpu.vector_store %arg7[%c0_27, %c0_28, %c8_29], %13 {strides = array<i32>} : memref<10x16x12xbf16, #tpu.memory_space<vmem>>, vector<8x16x4xbf16>,
    %c0_30 = arith.constant 0 : index
    %c0_31 = arith.constant 0 : index
    %c2_32 = arith.constant 2 : index
    %c0_33 = arith.constant 0 : index
    %15 = vector.load %arg3[%c0_30, %c0_31, %c2_32, %c0_33] : memref<1x2x18x4xbf16, #tpu.memory_space<vmem>>, vector<1x2x16x4xbf16>
    %16 = vector.shape_cast %15 : vector<1x2x16x4xbf16> to vector<2x16x4xbf16>
    %c8_34 = arith.constant 8 : index
    %c0_35 = arith.constant 0 : index
    %c8_36 = arith.constant 8 : index
    %17 = vector.load %arg7[%c8_34, %c0_35, %c8_36] : memref<10x16x12xbf16, #tpu.memory_space<vmem>>, vector<2x16x4xbf16>
    tpu.vector_store %arg7[%c8_34, %c0_35, %c8_36], %16 {strides = array<i32>} : memref<10x16x12xbf16, #tpu.memory_space<vmem>>, vector<2x16x4xbf16>,
    %c0_37 = arith.constant 0 : index
    %c0_38 = arith.constant 0 : index
    %c0_39 = arith.constant 0 : index
    %18 = vector.load %arg7[%c0_37, %c0_38, %c0_39] : memref<10x16x12xbf16, #tpu.memory_space<vmem>>, vector<8x16x12xbf16>
    %19 = vector.shape_cast %18 : vector<8x16x12xbf16> to vector<128x12xbf16>
    %c1_40 = arith.constant 1 : index
    %c0_41 = arith.constant 0 : index
    %c0_42 = arith.constant 0 : index
    %20 = vector.load %arg7[%c1_40, %c0_41, %c0_42] : memref<10x16x12xbf16, #tpu.memory_space<vmem>>, vector<8x16x12xbf16>
    %21 = vector.shape_cast %20 : vector<8x16x12xbf16> to vector<128x12xbf16>
    %c2_43 = arith.constant 2 : index
    %c0_44 = arith.constant 0 : index
    %c0_45 = arith.constant 0 : index
    %22 = vector.load %arg7[%c2_43, %c0_44, %c0_45] : memref<10x16x12xbf16, #tpu.memory_space<vmem>>, vector<8x16x12xbf16>
    %23 = vector.shape_cast %22 : vector<8x16x12xbf16> to vector<128x12xbf16>
    %c0_46 = arith.constant 0 : index
    %c0_47 = arith.constant 0 : index
    %24 = vector.load %arg5[%c0_46, %c0_47] : memref<1x8xf32, #tpu.memory_space<vmem>>, vector<1x8xf32>
    %c0_48 = arith.constant 0 : index
    %c0_49 = arith.constant 0 : index
    %c0_50 = arith.constant 0 : index
    %c0_51 = arith.constant 0 : index
    %25 = vector.load %arg4[%c0_48, %c0_49, %c0_50, %c0_51] : memref<2x2x12x8xbf16, #tpu.memory_space<vmem>>, vector<1x1x12x8xbf16>
    %26 = vector.shape_cast %25 : vector<1x1x12x8xbf16> to vector<12x8xbf16>
    %cst = arith.constant dense<0.000000e+00> : vector<128x8xf32>
    %27 = tpu.matmul %19, %26, %cst {dimension_numbers = #tpu.dot_dimension_numbers<[1], [0], [0], [1], [0, 0, 1, 1], [], []>} : vector<128x12xbf16>, vector<12x8xbf16>, vector<128x8xf32> -> vector<128x8xf32>
    %c0_52 = arith.constant 0 : index
    %c1_53 = arith.constant 1 : index
    %c0_54 = arith.constant 0 : index
    %c0_55 = arith.constant 0 : index
    %28 = vector.load %arg4[%c0_52, %c1_53, %c0_54, %c0_55] : memref<2x2x12x8xbf16, #tpu.memory_space<vmem>>, vector<1x1x12x8xbf16>
    %29 = vector.shape_cast %28 : vector<1x1x12x8xbf16> to vector<12x8xbf16>
    %cst_56 = arith.constant dense<0.000000e+00> : vector<128x8xf32>
    %30 = tpu.matmul %21, %29, %cst_56 {dimension_numbers = #tpu.dot_dimension_numbers<[1], [0], [0], [1], [0, 0, 1, 1], [], []>} : vector<128x12xbf16>, vector<12x8xbf16>, vector<128x8xf32> -> vector<128x8xf32>
    %31 = arith.addf %27, %30 : vector<128x8xf32>
    %32 = vector.broadcast %24 : vector<1x8xf32> to vector<128x8xf32>
    %33 = arith.addf %31, %32 : vector<128x8xf32>
    %34 = vector.shape_cast %33 : vector<128x8xf32> to vector<8x16x8xf32>
    %c0_57 = arith.constant 0 : index
    %c0_58 = arith.constant 0 : index
    %c0_59 = arith.constant 0 : index
    %c0_60 = arith.constant 0 : index
    %c0_61 = arith.constant 0 : index
    %35 = vector.load %arg6[%c0_57, %c0_58, %c0_59, %c0_60, %c0_61] : memref<1x8x2x16x8xf32, #tpu.memory_space<vmem>>, vector<1x8x1x16x8xf32>
    %36 = vector.shape_cast %35 : vector<1x8x1x16x8xf32> to vector<8x16x8xf32>
    %37 = vector.shape_cast %34 : vector<8x16x8xf32> to vector<1x8x1x16x8xf32>
    tpu.vector_store %arg6[%c0_57, %c0_58, %c0_59, %c0_60, %c0_61], %37 {strides = array<i32>} : memref<1x8x2x16x8xf32, #tpu.memory_space<vmem>>, vector<1x8x1x16x8xf32>,
    %c1_62 = arith.constant 1 : index
    %c0_63 = arith.constant 0 : index
    %c0_64 = arith.constant 0 : index
    %c0_65 = arith.constant 0 : index
    %38 = vector.load %arg4[%c1_62, %c0_63, %c0_64, %c0_65] : memref<2x2x12x8xbf16, #tpu.memory_space<vmem>>, vector<1x1x12x8xbf16>
    %39 = vector.shape_cast %38 : vector<1x1x12x8xbf16> to vector<12x8xbf16>
    %cst_66 = arith.constant dense<0.000000e+00> : vector<128x8xf32>
    %40 = tpu.matmul %21, %39, %cst_66 {dimension_numbers = #tpu.dot_dimension_numbers<[1], [0], [0], [1], [0, 0, 1, 1], [], []>} : vector<128x12xbf16>, vector<12x8xbf16>, vector<128x8xf32> -> vector<128x8xf32>
    %c1_67 = arith.constant 1 : index
    %c1_68 = arith.constant 1 : index
    %c0_69 = arith.constant 0 : index
    %c0_70 = arith.constant 0 : index
    %41 = vector.load %arg4[%c1_67, %c1_68, %c0_69, %c0_70] : memref<2x2x12x8xbf16, #tpu.memory_space<vmem>>, vector<1x1x12x8xbf16>
    %42 = vector.shape_cast %41 : vector<1x1x12x8xbf16> to vector<12x8xbf16>
    %cst_71 = arith.constant dense<0.000000e+00> : vector<128x8xf32>
    %43 = tpu.matmul %23, %42, %cst_71 {dimension_numbers = #tpu.dot_dimension_numbers<[1], [0], [0], [1], [0, 0, 1, 1], [], []>} : vector<128x12xbf16>, vector<12x8xbf16>, vector<128x8xf32> -> vector<128x8xf32>
    %44 = arith.addf %40, %43 : vector<128x8xf32>
    %45 = vector.broadcast %24 : vector<1x8xf32> to vector<128x8xf32>
    %46 = arith.addf %44, %45 : vector<128x8xf32>
    %47 = vector.shape_cast %46 : vector<128x8xf32> to vector<8x16x8xf32>
    %c0_72 = arith.constant 0 : index
    %c0_73 = arith.constant 0 : index
    %c1_74 = arith.constant 1 : index
    %c0_75 = arith.constant 0 : index
    %c0_76 = arith.constant 0 : index
    %48 = vector.load %arg6[%c0_72, %c0_73, %c1_74, %c0_75, %c0_76] : memref<1x8x2x16x8xf32, #tpu.memory_space<vmem>>, vector<1x8x1x16x8xf32>
    %49 = vector.shape_cast %48 : vector<1x8x1x16x8xf32> to vector<8x16x8xf32>
    %50 = vector.shape_cast %47 : vector<8x16x8xf32> to vector<1x8x1x16x8xf32>
    tpu.vector_store %arg6[%c0_72, %c0_73, %c1_74, %c0_75, %c0_76], %50 {strides = array<i32>} : memref<1x8x2x16x8xf32, #tpu.memory_space<vmem>>, vector<1x8x1x16x8xf32>,
    return
  }
  func.func @transform_0(%arg0: i32, %arg1: i32) -> (i32, i32, i32, i32) {
    %c0_i32 = arith.constant 0 : i32
    %c0_i32_0 = arith.constant 0 : i32
    %c0_i32_1 = arith.constant 0 : i32
    return %arg0, %arg1, %c0_i32, %c0_i32_0 : i32, i32, i32, i32
  }
  func.func @transform_1(%arg0: i32, %arg1: i32) -> (i32, i32, i32, i32) {
    %c1_i32 = arith.constant 1 : i32
    %0 = arith.addi %arg1, %c1_i32 : i32
    %c4_i32 = arith.constant 4 : i32
    %1 = arith.muli %0, %c4_i32 : i32
    %c0_i32 = arith.constant 0 : i32
    %c0_i32_0 = arith.constant 0 : i32
    %c0_i32_1 = arith.constant 0 : i32
    return %arg0, %1, %c0_i32, %c0_i32_0 : i32, i32, i32, i32
  }
  func.func @transform_2(%arg0: i32, %arg1: i32) -> (i32, i32, i32, i32) {
    %c0_i32 = arith.constant 0 : i32
    %c0_i32_0 = arith.constant 0 : i32
    %c0_i32_1 = arith.constant 0 : i32
    %c0_i32_2 = arith.constant 0 : i32
    %c0_i32_3 = arith.constant 0 : i32
    return %c0_i32, %c0_i32_0, %c0_i32_1, %c0_i32_2 : i32, i32, i32, i32
  }
  func.func @transform_3(%arg0: i32, %arg1: i32) -> (i32, i32) {
    %c0_i32 = arith.constant 0 : i32
    %c0_i32_0 = arith.constant 0 : i32
    %c0_i32_1 = arith.constant 0 : i32
    return %c0_i32, %c0_i32_0 : i32, i32
  }
  func.func @transform_4(%arg0: i32, %arg1: i32) -> (i32, i32, i32, i32, i32) {
    %c0_i32 = arith.constant 0 : i32
    %c0_i32_0 = arith.constant 0 : i32
    %c0_i32_1 = arith.constant 0 : i32
    %c0_i32_2 = arith.constant 0 : i32
    return %arg0, %arg1, %c0_i32, %c0_i32_0, %c0_i32_1 : i32, i32, i32, i32, i32
  }
}

</mosaic_0001>

<bundles_post_ra>
// kernel: upsample_forward.1
= control target key start
LH: loop header
LB: loop body
LE: loop exit
PB: predicated region body
PF: predicated region fallthrough
CT: control target
= control target key end

     0   :  { %s2037_s15 = smov 0   ;;  %s2039_s16 = smov 0   ;;  %s2395_s0 = inlined_call_operand.vmem [shape: bf16[2,18,18,4], index: 0, kind: input, shape index: {}, may-alias: {0,1}]   ;;  %s2396_s1 = inlined_call_operand.vmem [shape: bf16[2,18,18,4], index: 1, kind: input, shape index: {}, may-alias: {0,1}]   ;;  %s2397_s2 = inlined_call_operand.vmem [shape: bf16[2,2,12,8], index: 2, kind: input, shape index: {}]   ;;  %s2398_s3 = inlined_call_operand.vmem [shape: f32[1,8], index: 3, kind: input, shape index: {}]   ;;  %s2399_s4 = inlined_call_operand.vmem [shape: f32[2,16,2,16,8], index: 4, kind: output, shape index: {}]  }
   0x1   :  { %s2041_s17 = smov 0   ;;  %s2043_s18 = smov 0  }
   0x2   :  { %s2045_s19 = smov 0  }
   0x3 LB: > { %s23_s20 = sadd.s32 1, %s2000_s17  ;;  %s26_s21 = sadd.s32 1, %s2004_s18  ;;  %s2008_s19 = sphi %s2045_s19, %s14_s19   ;;  %s2004_s18 = sphi %s2043_s18, %s2404_s18   ;;  %s2000_s17 = sphi %s2041_s17, %s2403_s17   ;;  %s1996_s16 = sphi %s2039_s16, %s2402_s16   ;;  %s1992_s15 = sphi %s2037_s15, %s2401_s15  }
   0x4   : > { %p24_p0 = scmp.ge.s32.totalorder %s23_s20, 2  ;;  %p1597_p1 = scmp.ge.s32.totalorder %s2008_s19, 1 }
   0x5   : > { %p220_p2 = scmp.lt.s32.totalorder %s2008_s19, 5 }
   0x6   : > { %s2406_s20 = smov (%p24_p0, %s23_s20), 0  ;;  %s2408_s21 = smov (!%p24_p0, %s26_s21), %s2004_s18 }
   0x7   : > { %p221_p3 = pnand %p1597_p1, %p220_p2  ;;  %p28_p4 = scmp.ge.s32.totalorder %s2408_s21, 2 }
   0x8   : > { %s2067_s22 = sshll.u32 (!%p221_p3), %s1992_s15, 3  ;;  %p279_p5 = scmp.lt.s32.totalorder (!%p221_p3), %s1996_s16, 1  ;;  %vm501_vm0 = vsmask.f32 (!%p221_p3), 7424  ;;  %vm773_vm1 = vcmask (!%p221_p3), 1046528   ;;  %vm385_vm2 = vcmask (!%p221_p3), 31744  }
   0x9   : > { %s2410_s21 = smov (%p28_p4, %s2408_s21), 0  ;;  %224 = sbr.rel (%p221_p3) target bundleno = 439 (0x1b7), region = 36 }
   0xa   : > { %p281_p6 = scmp.lt.s32.totalorder (!%p221_p3), %s2067_s22, 17  ;;  %s1726_s26 = sadd.s32 (!%p221_p3), 8, %s2067_s22  ;;  %vm929_vm3 = vcmask (!%p221_p3), 1045504   ;;  %vm622_vm4 = vcmask (!%p221_p3), 64544   ;;  %vm822_vm5 = vcmask (!%p221_p3), 97344   ;;  %vm904_vm6 = vcmask (!%p221_p3), 97280  }
   0xb   : > { %p2084_p7 = scmp.lt.s32.totalorder (!%p221_p3), %s1726_s26, 17  ;;  %s2010_s7 = smov (!%p221_p3), 8   ;;  %vm1181_vm7 = vcmask (!%p221_p3), 64512  }
   0xc   : > { %s2011_s8 = smov (!%p221_p3), 4   ;;  %p312_p8 = scmp.lt.s32.totalorder (!%p221_p3), %s2067_s22, 15 }
  0x10   : > { %s2412_s16 = smov (!%p279_p5, %s1996_s16), 1  ;;  %s2414_s26 = smov (!%p2084_p7, %s1726_s26), 17 }
  0x11   : > { %s282_s23 = scalar_select %p281_p6, %s2067_s22, 17 }
  0x12   : > { %s1872_s24 = smul.u32 54, %s2412_s16  ;;  %s2416_s22 = smov (!%p312_p8, %s2067_s22), 15 }
  0x13   : > { %s1871_s25 = smul.u32 3, %s282_s23  ;;  %s1604_s30 = sshll.u32 %s2416_s22, 2 }
  0x14   : > { %s1873_s9 = smul.u32 3, %s2414_s26 }
  0x15   : > { %s285_s27 = sadd.s32 %s1872_s24, %s1871_s25 }
  0x16   : > { %s1599_s28 = sshll.u32 %s285_s27, 2  ;;  %s303_s10 = sadd.s32 %s1873_s9, %s1872_s24 }
  0x17   : > { %s2080_s5 = scalar_lea.vmem %s2395_s0, %s1599_s28  ;;  %s1602_s11 = sshll.u32 %s303_s10, 2 }
  0x18   : > { %v1916_v0 = vld [vmem:[%s2080_s5 + $0xc] sm:$0xff]   ;;  %v1917_v1 = vld [vmem:[%s2080_s5 + $0x14] ss:$0 sps:$4 sm:$0x11]   ;;  %v1920_v8 = vld [vmem:[%s2080_s5 + $0x18] sm:$0xff]   ;;  %s2150_s14 = scalar_lea.vmem %s2396_s1, %s1602_s11 }
  0x19   : > { %v1918_v2 = vld [vmem:[%s2080_s5 + $0xc] sm:$0xfe]   ;;  %v515_v3 = vshrl.u32 %v1916_v0, 16  ;;  %v517_v4 = vshll.u32 %v1916_v0, 16  ;;  %v522_v5 = vshll.u32 %v1917_v1, 16  ;;  %v1922_v12 = vld [vmem:[%s2080_s5 + $0x24] sm:$0xff]  }
  0x1a   : > { %v1919_v6 = vld [vmem:[%s2080_s5 + $0x14] ss:$0 sps:$4 sm:$0x11]   ;;  %v777_v7 = vrot.slane %v1918_v2, 1  ;;  %v527_v14 = vshrl.u32 %v1920_v8, 16  ;;  %v529_v15 = vshll.u32 %v1920_v8, 16 }
  0x1b   : > { %v519_v9 = vrot.slane %v517_v4, 1  ;;  %v524_v10 = vrot.slane %v522_v5, 1  ;;  %v778_v11 = vrot.slane %v1919_v6, 1  ;;  %v1921_v13 = vld [vmem:[%s2080_s5 + $0x20] ss:$0 sps:$4 sm:$0x11]  }
  0x1c   : > { %v1928_v16 = vld [vmem:[%s2080_s5 + $0x30] sm:$0xff]   ;;  %v531_v19 = vrot.slane %v529_v15, 1  ;;  %v534_v20 = vshll.u32 %v1921_v13, 16  ;;  %v1923_v21 = vld [vmem:[%s2080_s5 + $0x2c] ss:$0 sps:$4 sm:$0x11]  }
  0x1d   : > { %v520_v17 = vor.u32 %v519_v9, %v515_v3  ;;  %v779_v18 = vsel %vm773_vm1, %v777_v7, %v778_v11  ;;  %v539_v22 = vshrl.u32 %v1922_v12, 16  ;;  %v541_v24 = vshll.u32 %v1922_v12, 16  ;;  %v1924_v29 = vld [vmem:[%s2080_s5 + $0x18] sm:$0xfe]   ;;  %v1926_v37 = vld [vmem:[%s2080_s5 + $0x24] sm:$0xfe]  }
  0x1e   : > { %800 = vrot.lane.b32.xlu1 %v779_v18, %s2010_s7  ;;  %v551_v25 = vshrl.u32 %v1928_v16, 16  ;;  %v532_v26 = vor.u32 %v531_v19, %v527_v14  ;;  %v536_v27 = vrot.slane %v534_v20, 1  ;;  %v546_v28 = vshll.u32 %v1923_v21, 16  ;;  %v1925_v31 = vld [vmem:[%s2080_s5 + $0x20] ss:$0 sps:$4 sm:$0x11]  }
  0x1f   : > { %v525_v23 = vsel %vm501_vm0, %v520_v17, %v524_v10  ;;  %v543_v30 = vrot.slane %v541_v24, 1  ;;  %v780_v34 = vrot.slane %v1924_v29, 1  ;;  %v781_v36 = vrot.slane %v1925_v31, 1  ;;  %v1927_v38 = vld [vmem:[%s2080_s5 + $0x2c] ss:$0 sps:$4 sm:$0x11]  }
  0x20   : > { %600 = vrot.lane.b32.xlu0 %v525_v23, %s2011_s8  ;;  %v537_v32 = vsel %vm501_vm0, %v532_v26, %v536_v27  ;;  %v548_v33 = vrot.slane %v546_v28, 1  ;;  %v783_v41 = vrot.slane %v1926_v37, 1  ;;  %v784_v42 = vrot.slane %v1927_v38, 1  ;;  %v1929_v43 = vld [vmem:[%s2080_s5 + $0x38] ss:$0 sps:$4 sm:$0x11]  }
  0x21   : > { %v544_v35 = vor.u32 %v543_v30, %v539_v22  ;;  %v782_v40 = vsel %vm773_vm1, %v780_v34, %v781_v36  ;;  %v1930_v44 = vld [vmem:[%s2080_s5 + $0x3c] sm:$0xff]   ;;  %v553_v45 = vshll.u32 %v1928_v16, 16  ;;  %v1936_v46 = vld [vmem:[%s2080_s5 + $0x48] sm:$0xff]   ;;  %v558_v48 = vshll.u32 %v1929_v43, 16  ;;  %v1932_v58 = vld [vmem:[%s2080_s5 + $0x30] sm:$0xfe]  }
  0x22   : > { %v785_v47 = vsel %vm773_vm1, %v783_v41, %v784_v42  ;;  %v1931_v49 = vld [vmem:[%s2080_s5 + $0x44] ss:$0 sps:$4 sm:$0x11]   ;;  %v563_v51 = vshrl.u32 %v1930_v44, 16  ;;  %v565_v52 = vshll.u32 %v1930_v44, 16  ;;  %v575_v53 = vshrl.u32 %v1936_v46, 16 }
  0x23   : > { %v549_v39 = vsel %vm501_vm0, %v544_v35, %v548_v33  ;;  %v555_v50 = vrot.slane %v553_v45, 1  ;;  %v560_v54 = vrot.slane %v558_v48, 1  ;;  %v570_v55 = vshll.u32 %v1931_v49, 16  ;;  %v1933_v59 = vld [vmem:[%s2080_s5 + $0x38] ss:$0 sps:$4 sm:$0x11]  }
  0x24   : > { %602 = vrot.lane.b32.xlu0 %v537_v32, %s2011_s8  ;;  %604 = vrot.lane.b32.xlu1 %v549_v39, %s2011_s8  ;;  %v567_v57 = vrot.slane %v565_v52, 1  ;;  %v577_v61 = vshll.u32 %v1936_v46, 16  ;;  %v786_v0 = vrot.slane %v1932_v58, 1  ;;  %v787_v1 = vrot.slane %v1933_v59, 1  ;;  %v1934_v2 = vld [vmem:[%s2080_s5 + $0x3c] sm:$0xfe]  }
  0x25   : > { %v556_v56 = vor.u32 %v555_v50, %v551_v25  ;;  %v572_v60 = vrot.slane %v570_v55, 1  ;;  %v1935_v3 = vld [vmem:[%s2080_s5 + $0x44] ss:$0 sps:$4 sm:$0x11]   ;;  %v789_v7 = vrot.slane %v1934_v2, 1  ;;  %v1938_v8 = vld [vmem:[%s2080_s5 + $0x54] sm:$0xff]  }
  0x26   : > { %v568_v63 = vor.u32 %v567_v57, %v563_v51  ;;  %v579_v4 = vrot.slane %v577_v61, 1  ;;  %v788_v6 = vsel %vm773_vm1, %v786_v0, %v787_v1  ;;  %v790_v9 = vrot.slane %v1935_v3, 1  ;;  %v1937_v10 = vld [vmem:[%s2080_s5 + $0x50] ss:$0 sps:$4 sm:$0x11]   ;;  %v1952_v33 = vld [vmem:[%s2080_s5] sm:$0xff]  }
  0x27   : > { %v561_v62 = vsel %vm501_vm0, %v556_v56, %v560_v54  ;;  %v587_v11 = vshrl.u32 %v1938_v8, 16  ;;  %v589_v12 = vshll.u32 %v1938_v8, 16  ;;  %v582_v15 = vshll.u32 %v1937_v10, 16  ;;  %v1939_v16 = vld [vmem:[%s2080_s5 + $0x5c] ss:$0 sps:$4 sm:$0x11]  }
  0x28   : > { %802 = vrot.lane.b32.xlu0 %v782_v40, %s2010_s7  ;;  %804 = vrot.lane.b32.xlu1 %v785_v47, %s2010_s7  ;;  %v573_v5 = vsel %vm501_vm0, %v568_v63, %v572_v60  ;;  %v791_v13 = vsel %vm773_vm1, %v789_v7, %v790_v9  ;;  %v580_v14 = vor.u32 %v579_v4, %v575_v53  ;;  %v594_v19 = vshll.u32 %v1939_v16, 16  ;;  %v1940_v20 = vld [vmem:[%s2080_s5 + $0x48] sm:$0xfe]   ;;  %v1941_v22 = vld [vmem:[%s2080_s5 + $0x50] ss:$0 sps:$4 sm:$0x11]  }
  0x29   : > { %v591_v17 = vrot.slane %v589_v12, 1  ;;  %v584_v18 = vrot.slane %v582_v15, 1  ;;  %v792_v25 = vrot.slane %v1940_v20, 1  ;;  %v1942_v26 = vld [vmem:[%s2080_s5 + $0x54] sm:$0xfe]   ;;  %v793_v27 = vrot.slane %v1941_v22, 1 }
  0x2a   : > { %v596_v24 = vrot.slane %v594_v19, 1  ;;  %v1943_v28 = vld [vmem:[%s2080_s5 + $0x5c] ss:$0 sps:$4 sm:$0x11]   ;;  %v795_v30 = vrot.slane %v1942_v26, 1  ;;  %v1956_v34 = vld [vmem:[%s2080_s5 + $0xc] sm:$0xff]  }
  0x2b   : > { %v592_v21 = vor.u32 %v591_v17, %v587_v11  ;;  %v585_v23 = vsel %vm501_vm0, %v580_v14, %v584_v18  ;;  %v794_v31 = vsel %vm773_vm1, %v792_v25, %v793_v27  ;;  %v796_v32 = vrot.slane %v1943_v28, 1  ;;  %v1944_v36 = vld [vmem:[%s2150_s14] sm:$0xff]   ;;  %v1945_v37 = vld [vmem:[%s2150_s14 + $0x8] ss:$0 sps:$4 sm:$0x11]   ;;  %387 = vst.msk [vmem:[#allocation2 + $0x8] sm:$0xff] %vm385_vm2, %v1956_v34 }
  0x2c   : > { %606 = vrot.lane.b32.xlu0 %v561_v62, %s2011_s8  ;;  %608 = vrot.lane.b32.xlu1 %v573_v5, %s2011_s8  ;;  %v1946_v38 = vld [vmem:[%s2150_s14 + $0xc] sm:$0xff]   ;;  %v503_v39 = vshrl.u32 %v1952_v33, 16  ;;  %v654_v40 = vshrl.u32 %v1944_v36, 16  ;;  %v656_v41 = vshll.u32 %v1944_v36, 16  ;;  %v661_v42 = vshll.u32 %v1945_v37, 16  ;;  %v1957_v2 = vld [vmem:[%s2080_s5 + $0x18] sm:$0xff]  }
  0x2d   : > { %v597_v29 = vsel %vm501_vm0, %v592_v21, %v596_v24  ;;  %v797_v35 = vsel %vm773_vm1, %v795_v30, %v796_v32  ;;  %v1947_v43 = vld [vmem:[%s2150_s14 + $0x14] ss:$0 sps:$4 sm:$0x11]   ;;  %v1953_v44 = vld [vmem:[%s2080_s5 + $0x8] ss:$0 sps:$4 sm:$0x11]  }
  0x2e   : > { %v666_v45 = vshrl.u32 %v1946_v38, 16  ;;  %v668_v46 = vshll.u32 %v1946_v38, 16  ;;  %v658_v47 = vrot.slane %v656_v41, 1  ;;  %v663_v48 = vrot.slane %v661_v42, 1  ;;  %v1948_v52 = vld [vmem:[%s2150_s14] sm:$0xfe]  }
  0x2f   : > { %v673_v49 = vshll.u32 %v1947_v43, 16  ;;  %v505_v50 = vshll.u32 %v1952_v33, 16  ;;  %v1949_v53 = vld [vmem:[%s2150_s14 + $0x8] ss:$0 sps:$4 sm:$0x11]   ;;  %v853_v58 = vrot.slane %v1948_v52, 1 }
  0x30   : > { %806 = vrot.lane.b32.xlu0 %v788_v6, %s2010_s7  ;;  %808 = vrot.lane.b32.xlu1 %v791_v13, %s2010_s7  ;;  %v670_v51 = vrot.slane %v668_v46, 1  ;;  %v659_v54 = vor.u32 %v658_v47, %v654_v40  ;;  %v854_v59 = vrot.slane %v1949_v53, 1  ;;  %v1950_v60 = vld [vmem:[%s2150_s14 + $0xc] sm:$0xfe]   ;;  %v510_v63 = vshll.u32 %v1953_v44, 16  ;;  %388 = vst.msk [vmem:[#allocation2 + $0x10] sm:$0xff] %vm385_vm2, %v1957_v2 }
  0x31   : > { %v675_v55 = vrot.slane %v673_v49, 1  ;;  %v507_v56 = vrot.slane %v505_v50, 1  ;;  %v1951_v62 = vld [vmem:[%s2150_s14 + $0x14] ss:$0 sps:$4 sm:$0x11]   ;;  %v856_v1 = vrot.slane %v1950_v60, 1 }
  0x32   : > { %v671_v57 = vor.u32 %v670_v51, %v666_v45  ;;  %v664_v61 = vsel %vm501_vm0, %v659_v54, %v663_v48  ;;  %v855_v3 = vsel %vm773_vm1, %v853_v58, %v854_v59  ;;  %v857_v4 = vrot.slane %v1951_v62, 1  ;;  %v1954_v7 = vld [vmem:[%s2080_s5] sm:$0xfe]   ;;  %v1955_v8 = vld [vmem:[%s2080_s5 + $0x8] ss:$0 sps:$4 sm:$0x11]  }
  0x33   : > { %v508_v5 = vor.u32 %v507_v56, %v503_v39  ;;  %v512_v6 = vrot.slane %v510_v63, 1  ;;  %v1958_v9 = vld [vmem:[%s2080_s5 + $0x24] sm:$0xff]   ;;  %v774_v11 = vrot.slane %v1954_v7, 1  ;;  %v775_v12 = vrot.slane %v1955_v8, 1  ;;  %v1959_v13 = vld [vmem:[%s2080_s5 + $0x30] sm:$0xff]   ;;  %v1962_v18 = vld [vmem:[%s2080_s5 + $0x3c] sm:$0xff]  }
  0x34   : > { %610 = vrot.lane.b32.xlu0 %v585_v23, %s2011_s8  ;;  %612 = vrot.lane.b32.xlu1 %v597_v29, %s2011_s8  ;;  %v676_v0 = vsel %vm501_vm0, %v671_v57, %v675_v55  ;;  %v858_v10 = vsel %vm773_vm1, %v856_v1, %v857_v4  ;;  %389 = vst.msk [vmem:[#allocation2 + $0x18] sm:$0xff] %vm385_vm2, %v1958_v9  ;;  %v1960_v15 = vld [vmem:[%s2397_s2 + $0x8] sm:$0x3f]   ;;  %390 = vst.msk [vmem:[#allocation2 + $0x20] sm:$0xff] %vm385_vm2, %v1959_v13  ;;  %v1961_v17 = vld [vmem:[%s2397_s2 + $0x18] sm:$0x3f]  }
  0x35   : > { %v513_v14 = vsel %vm501_vm0, %v508_v5, %v512_v6  ;;  %v776_v16 = vsel %vm773_vm1, %v774_v11, %v775_v12  ;;  %1867 = vmatprep.subr.msk.bf16.mxu0 %vm929_vm3, %v1960_v15  ;;  %v931_v19 = vsel %vm929_vm3, %v1960_v15, 0  ;;  %v1963_v20 = vld [vmem:[%s2397_s2] sm:$0x3f]   ;;  %v1965_v21 = vld [vmem:[%s2080_s5 + $0x48] sm:$0xff]   ;;  %1869 = vmatprep.subr.msk.bf16.mxu1 %vm929_vm3, %v1961_v17  ;;  %391 = vst.msk [vmem:[#allocation2 + $0x28] sm:$0xff] %vm385_vm2, %v1962_v18  ;;  %v1234_v22 = vsel %vm929_vm3, %v1961_v17, 0 }
  0x36   : > { %v1964_v23 = vld [vmem:[%s2397_s2 + $0x10] sm:$0x3f]   ;;  %1764 = vmatpush3.bf16.msra.mxu0 %v931_v19  ;;  %v1060_v25 = vsel %vm929_vm3, %v1963_v20, 0  ;;  %392 = vst.msk [vmem:[#allocation2 + $0x30] sm:$0xff] %vm385_vm2, %v1965_v21  ;;  %v1967_v26 = vld [vmem:[%s2150_s14] sm:$0xff]   ;;  %1800 = vmatpush3.bf16.msra.mxu1 %v1234_v22 }
  0x37   : > { %v1966_v24 = vld [vmem:[%s2080_s5 + $0x54] sm:$0xff]   ;;  %1868 = vmatprep.subr.msk.bf16.mxu0 %vm929_vm3, %v1963_v20  ;;  %v1339_v27 = vsel %vm929_vm3, %v1964_v23, 0  ;;  %v1968_v28 = vld [vmem:[%s2150_s14 + $0xc] sm:$0xff]   ;;  %1870 = vmatprep.subr.msk.bf16.mxu1 %vm929_vm3, %v1964_v23  ;;  %411 = vst.msk [vmem:[#allocation2 + $0x40] sm:$0xff] %vm385_vm2, %v1967_v26  ;;  %v1969_v29 = vld [vmem:[%s2080_s5] sm:$0xff]   ;;  %s1605_s5 = sshll.u32 %s2412_s16, 6 }
  0x38   : > { %810 = vrot.lane.b32.xlu0 %v794_v31, %s2010_s7  ;;  %812 = vrot.lane.b32.xlu1 %v797_v35, %s2010_s7  ;;  %393 = vst.msk [vmem:[#allocation2 + $0x38] sm:$0xff] %vm385_vm2, %v1966_v24  ;;  %412 = vst.msk [vmem:[#allocation2 + $0x48] sm:$0xff] %vm385_vm2, %v1968_v28  ;;  %s316_s6 = sadd.s32 %s1605_s5, %s1604_s30  ;;  %v2277_v60 = vld [vmem:[%s2398_s3] ss:$0 sm:$0xff] }
  0x39   : > { %386 = vst.msk [vmem:[#allocation2] sm:$0xff] %vm385_vm2, %v1969_v29 }
  0x3c   : > { %677 = vrot.lane.b32.xlu0 %v664_v61, %s2011_s8  ;;  %679 = vrot.lane.b32.xlu1 %v676_v0, %s2011_s8 }
  0x40   : > { %859 = vrot.lane.b32.xlu0 %v855_v3, %s2010_s7  ;;  %861 = vrot.lane.b32.xlu1 %v858_v10, %s2010_s7 }
  0x44   : > { %598 = vrot.lane.b32.xlu0 %v513_v14, %s2011_s8  ;;  %798 = vrot.lane.b32.xlu1 %v776_v16, %s2010_s7  ;;  %s1606_s7 = sshll.u32 %s316_s6, 3 }
  0x45   : > { %s2282_s12 = scalar_lea.vmem %s2399_s4, %s1606_s7 }
  0x90   : > { %v801_v30 = vpop.permute.xlu1 %800 }
  0x92   : > { %v601_v31 = vpop.permute.xlu0 %600 }
  0x93   : > { %624 = vst.msk [vmem:[#allocation2 + $0x8] sm:$0xff] %vm622_vm4, %v601_v31 }
  0x94   : > { %824 = vst.msk [vmem:[#allocation2 + $0x8] sm:$0xff] %vm822_vm5, %v801_v30 }
  0x96   : > { %v603_v32 = vpop.permute.xlu0 %602  ;;  %v605_v33 = vpop.permute.xlu1 %604 }
  0x97   : > { %625 = vst.msk [vmem:[#allocation2 + $0x10] sm:$0xff] %vm622_vm4, %v603_v32  ;;  %626 = vst.msk [vmem:[#allocation2 + $0x18] sm:$0xff] %vm622_vm4, %v605_v33 }
  0x9a   : > { %v803_v34 = vpop.permute.xlu0 %802  ;;  %v805_v36 = vpop.permute.xlu1 %804 }
  0x9b   : > { %825 = vst.msk [vmem:[#allocation2 + $0x10] sm:$0xff] %vm822_vm5, %v803_v34  ;;  %v876_v35 = vld [vmem:[#allocation2 + $0x8] sm:$0xff]  ;;  %826 = vst.msk [vmem:[#allocation2 + $0x18] sm:$0xff] %vm822_vm5, %v805_v36 }
  0x9c   : > { %1765 = vmatprep.mubr.msk.bf16.mxu0 %vm904_vm6, %v876_v35 }
  0x9e   : > { %v607_v37 = vpop.permute.xlu0 %606  ;;  %v609_v38 = vpop.permute.xlu1 %608 }
  0x9f   : > { %627 = vst.msk [vmem:[#allocation2 + $0x20] sm:$0xff] %vm622_vm4, %v607_v37  ;;  %628 = vst.msk [vmem:[#allocation2 + $0x28] sm:$0xff] %vm622_vm4, %v609_v38 }
  0xa2   : > { %v877_v39 = vld [vmem:[#allocation2 + $0x10] sm:$0xff]  ;;  %v807_v40 = vpop.permute.xlu0 %806  ;;  %v878_v41 = vld [vmem:[#allocation2 + $0x18] sm:$0xff]  ;;  %v809_v42 = vpop.permute.xlu1 %808 }
  0xa3   : > { %1766 = vmatmul.mubr.msk.bf16.vlgmr.msra.gmra.mrb[0].mxu0 %vm904_vm6, %v877_v39  ;;  %1801 = vmatprep.mubr.msk.bf16.mxu1 %vm904_vm6, %v877_v39  ;;  %827 = vst.msk [vmem:[#allocation2 + $0x20] sm:$0xff] %vm822_vm5, %v807_v40  ;;  %828 = vst.msk [vmem:[#allocation2 + $0x28] sm:$0xff] %vm822_vm5, %v809_v42 }
  0xa4   : > { %1782 = vmatpush3.bf16.msra.mxu0 %v1060_v25  ;;  %1769 = vmatprep.mubr.msk.bf16.mxu0 %vm904_vm6, %v878_v41 }
  0xa5   : > { %1802 = vmatmul.mubr.msk.bf16.vlgmr.msra.gmra.mrb[0].mxu1 %vm904_vm6, %v878_v41 }
  0xa6   : > { %1818 = vmatpush3.bf16.msra.mxu1 %v1339_v27  ;;  %v611_v43 = vpop.permute.xlu0 %610  ;;  %v613_v44 = vpop.permute.xlu1 %612 }
  0xa7   : > { %629 = vst.msk [vmem:[#allocation2 + $0x30] sm:$0xff] %vm622_vm4, %v611_v43  ;;  %630 = vst.msk [vmem:[#allocation2 + $0x38] sm:$0xff] %vm622_vm4, %v613_v44 }
  0xaa   : > { %v879_v45 = vld [vmem:[#allocation2 + $0x20] sm:$0xff]  ;;  %v811_v46 = vpop.permute.xlu0 %810  ;;  %v880_v47 = vld [vmem:[#allocation2 + $0x28] sm:$0xff]  ;;  %v813_v48 = vpop.permute.xlu1 %812 }
  0xab   : > { %1770 = vmatmul.mubr.msk.bf16.gmra.mrb[4].mxu0 %vm904_vm6, %v879_v45  ;;  %1805 = vmatprep.mubr.msk.bf16.mxu1 %vm904_vm6, %v879_v45  ;;  %829 = vst.msk [vmem:[#allocation2 + $0x30] sm:$0xff] %vm822_vm5, %v811_v46  ;;  %830 = vst.msk [vmem:[#allocation2 + $0x38] sm:$0xff] %vm822_vm5, %v813_v48 }
  0xac   : > { %1773 = vmatprep.mubr.msk.bf16.mxu0 %vm904_vm6, %v880_v47 }
  0xad   : > { %1806 = vmatmul.mubr.msk.bf16.gmra.mrb[4].mxu1 %vm904_vm6, %v880_v47 }
  0xae   : > { %v678_v50 = vpop.permute.xlu0 %677  ;;  %v680_v51 = vpop.permute.xlu1 %679 }
  0xaf   : > { %683 = vst.msk [vmem:[#allocation2 + $0x40] sm:$0xff] %vm622_vm4, %v678_v50  ;;  %684 = vst.msk [vmem:[#allocation2 + $0x48] sm:$0xff] %vm622_vm4, %v680_v51 }
  0xb2   : > { %v881_v49 = vld [vmem:[#allocation2 + $0x30] sm:$0xff]  ;;  %v882_v52 = vld [vmem:[#allocation2 + $0x38] sm:$0xff]  ;;  %v860_v53 = vpop.permute.xlu0 %859  ;;  %v862_v54 = vpop.permute.xlu1 %861 }
  0xb3   : > { %1774 = vmatmul.mubr.msk.bf16.gmra.mrb[8].mxu0 %vm904_vm6, %v881_v49  ;;  %1809 = vmatprep.mubr.msk.bf16.mxu1 %vm904_vm6, %v881_v49  ;;  %865 = vst.msk [vmem:[#allocation2 + $0x40] sm:$0xff] %vm822_vm5, %v860_v53  ;;  %866 = vst.msk [vmem:[#allocation2 + $0x48] sm:$0xff] %vm822_vm5, %v862_v54 }
  0xb4   : > { %1777 = vmatprep.mubr.msk.bf16.mxu0 %vm904_vm6, %v882_v52 }
  0xb5   : > { %1810 = vmatmul.mubr.msk.bf16.gmra.mrb[8].mxu1 %vm904_vm6, %v882_v52 }
  0xb6   : > { %v599_v55 = vpop.permute.xlu0 %598  ;;  %v799_v56 = vpop.permute.xlu1 %798 }
  0xb7   : > { %623 = vst.msk [vmem:[#allocation2] sm:$0xff] %vm622_vm4, %v599_v55 }
  0xb8   : > { %823 = vst.msk [vmem:[#allocation2] sm:$0xff] %vm822_vm5, %v799_v56 }
  0xba   : > { %v883_v57 = vld [vmem:[#allocation2 + $0x40] sm:$0xff]  ;;  %v892_v58 = vld [vmem:[#allocation2 + $0x48] sm:$0xff] }
  0xbb   : > { %1778 = vmatmul.mubr.msk.bf16.gmra.mrb[12].mxu0 %vm904_vm6, %v883_v57  ;;  %1813 = vmatprep.mubr.msk.bf16.mxu1 %vm904_vm6, %v883_v57 }
  0xbd   : > { %1814 = vmatmul.mubr.msk.bf16.gmra.mrb[12].mxu1 %vm904_vm6, %v892_v58 }
  0xbe   : > { %1819 = vmatprep.mubr.msk.bf16.mxu1 %vm904_vm6, %v876_v35 }
  0xbf   : > { %v867_v59 = vld [vmem:[#allocation2] sm:$0xff] }
  0xc0   : > { %1783 = vmatprep.mubr.msk.bf16.mxu0 %vm904_vm6, %v867_v59 }
  0xc3   : > { %1784 = vmatmul.mubr.msk.bf16.vlgmr.msra.gmra.mrb[0].mxu0 %vm904_vm6, %v876_v35 }
  0xc4   : > { %1787 = vmatprep.mubr.msk.bf16.mxu0 %vm904_vm6, %v877_v39 }
  0xc5   : > { %1820 = vmatmul.mubr.msk.bf16.vlgmr.msra.gmra.mrb[0].mxu1 %vm904_vm6, %v877_v39 }
  0xc6   : > { %1823 = vmatprep.mubr.msk.bf16.mxu1 %vm904_vm6, %v878_v41 }
  0xcb   : > { %1788 = vmatmul.mubr.msk.bf16.gmra.mrb[4].mxu0 %vm904_vm6, %v878_v41 }
  0xcc   : > { %1791 = vmatprep.mubr.msk.bf16.mxu0 %vm904_vm6, %v879_v45 }
  0xcd   : > { %1824 = vmatmul.mubr.msk.bf16.gmra.mrb[4].mxu1 %vm904_vm6, %v879_v45 }
  0xce   : > { %1827 = vmatprep.mubr.msk.bf16.mxu1 %vm904_vm6, %v880_v47 }
  0xd3   : > { %1792 = vmatmul.mubr.msk.bf16.gmra.mrb[8].mxu0 %vm904_vm6, %v880_v47 }
  0xd4   : > { %1795 = vmatprep.mubr.msk.bf16.mxu0 %vm904_vm6, %v881_v49 }
  0xd5   : > { %1828 = vmatmul.mubr.msk.bf16.gmra.mrb[8].mxu1 %vm904_vm6, %v881_v49 }
  0xd6   : > { %1831 = vmatprep.mubr.msk.bf16.mxu1 %vm904_vm6, %v882_v52 }
  0xdb   : > { %1796 = vmatmul.mubr.msk.bf16.gmra.mrb[12].mxu0 %vm904_vm6, %v882_v52 }
  0xdd   : > { %1832 = vmatmul.mubr.msk.bf16.gmra.mrb[12].mxu1 %vm904_vm6, %v883_v57 }
 0x196   : > { %v1785_v61 = vpop.f32.mrb[0].mxu0 }
 0x197   : > { %v1167_v62 = vadd.f32 %v1785_v61, %v2277_v60  ;;  %v1096_v63 = vpop.f32.mrb[1].mxu0 }
 0x198   : > { %v1821_v0 = vpop.f32.mrb[0].mxu1  ;;  %v1165_v1 = vadd.f32 %v2277_v60, %v1096_v63  ;;  %v1786_v3 = vpop.f32.mrb[2].mxu0 }
 0x199   : > { %v1440_v2 = vadd.f32 %v1821_v0, %v2277_v60  ;;  %v1375_v4 = vpop.f32.mrb[1].mxu1  ;;  %1184 = vst.msk [vmem:[%s2282_s12 + $0x20] sm:$0xff] %vm1181_vm7, %v1167_v62  ;;  %v1168_v5 = vadd.f32 %v1786_v3, %v2277_v60  ;;  %v1099_v7 = vpop.f32.mrb[3].mxu0 }
 0x19a   : > { %v1438_v6 = vadd.f32 %v2277_v60, %v1375_v4  ;;  %v1822_v8 = vpop.f32.mrb[2].mxu1  ;;  %1182 = vst.msk [vmem:[%s2282_s12] sm:$0xff] %vm1181_vm7, %v1165_v1  ;;  %v1166_v9 = vadd.f32 %v2277_v60, %v1099_v7 }
 0x19b   : > { %1702 = vst.msk [vmem:[%s2282_s12 + $0x30] sm:$0xff] %vm1181_vm7, %v1440_v2  ;;  %v1441_v10 = vadd.f32 %v1822_v8, %v2277_v60  ;;  %v1378_v11 = vpop.f32.mrb[3].mxu1  ;;  %1185 = vst.msk [vmem:[%s2282_s12 + $0x28] sm:$0xff] %vm1181_vm7, %v1168_v5 }
 0x19c   : > { %1700 = vst.msk [vmem:[%s2282_s12 + $0x10] sm:$0xff] %vm1181_vm7, %v1438_v6  ;;  %v1439_v12 = vadd.f32 %v2277_v60, %v1378_v11  ;;  %1183 = vst.msk [vmem:[%s2282_s12 + $0x8] sm:$0xff] %vm1181_vm7, %v1166_v9 }
 0x19d   : > { %1703 = vst.msk [vmem:[%s2282_s12 + $0x38] sm:$0xff] %vm1181_vm7, %v1441_v10 }
 0x19e   : > { %1701 = vst.msk [vmem:[%s2282_s12 + $0x18] sm:$0xff] %vm1181_vm7, %v1439_v12  ;;  %v1789_v13 = vpop.f32.mrb[4].mxu0 }
 0x19f   : > { %v1171_v14 = vadd.f32 %v1789_v13, %v2277_v60  ;;  %v1112_v15 = vpop.f32.mrb[5].mxu0 }
 0x1a0   : > { %v1825_v16 = vpop.f32.mrb[4].mxu1  ;;  %v1169_v17 = vadd.f32 %v2277_v60, %v1112_v15  ;;  %v1790_v19 = vpop.f32.mrb[6].mxu0 }
 0x1a1   : > { %v1444_v18 = vadd.f32 %v1825_v16, %v2277_v60  ;;  %v1391_v20 = vpop.f32.mrb[5].mxu1  ;;  %1188 = vst.msk [vmem:[%s2282_s12 + $0x60] sm:$0xff] %vm1181_vm7, %v1171_v14  ;;  %v1172_v21 = vadd.f32 %v1790_v19, %v2277_v60  ;;  %v1115_v23 = vpop.f32.mrb[7].mxu0 }
 0x1a2   : > { %v1442_v22 = vadd.f32 %v2277_v60, %v1391_v20  ;;  %v1826_v24 = vpop.f32.mrb[6].mxu1  ;;  %1186 = vst.msk [vmem:[%s2282_s12 + $0x40] sm:$0xff] %vm1181_vm7, %v1169_v17  ;;  %v1170_v25 = vadd.f32 %v2277_v60, %v1115_v23 }
 0x1a3   : > { %1706 = vst.msk [vmem:[%s2282_s12 + $0x70] sm:$0xff] %vm1181_vm7, %v1444_v18  ;;  %v1445_v26 = vadd.f32 %v1826_v24, %v2277_v60  ;;  %v1394_v27 = vpop.f32.mrb[7].mxu1  ;;  %1189 = vst.msk [vmem:[%s2282_s12 + $0x68] sm:$0xff] %vm1181_vm7, %v1172_v21 }
 0x1a4   : > { %1704 = vst.msk [vmem:[%s2282_s12 + $0x50] sm:$0xff] %vm1181_vm7, %v1442_v22  ;;  %v1443_v28 = vadd.f32 %v2277_v60, %v1394_v27  ;;  %1187 = vst.msk [vmem:[%s2282_s12 + $0x48] sm:$0xff] %vm1181_vm7, %v1170_v25 }
 0x1a5   : > { %1707 = vst.msk [vmem:[%s2282_s12 + $0x78] sm:$0xff] %vm1181_vm7, %v1445_v26 }
 0x1a6   : > { %1705 = vst.msk [vmem:[%s2282_s12 + $0x58] sm:$0xff] %vm1181_vm7, %v1443_v28  ;;  %v1793_v29 = vpop.f32.mrb[8].mxu0 }
 0x1a7   : > { %v1175_v30 = vadd.f32 %v1793_v29, %v2277_v60  ;;  %v1128_v31 = vpop.f32.mrb[9].mxu0 }
 0x1a8   : > { %v1829_v32 = vpop.f32.mrb[8].mxu1  ;;  %v1173_v33 = vadd.f32 %v2277_v60, %v1128_v31  ;;  %v1794_v35 = vpop.f32.mrb[10].mxu0 }
 0x1a9   : > { %v1448_v34 = vadd.f32 %v1829_v32, %v2277_v60  ;;  %v1407_v36 = vpop.f32.mrb[9].mxu1  ;;  %1192 = vst.msk [vmem:[%s2282_s12 + $0xa0] sm:$0xff] %vm1181_vm7, %v1175_v30  ;;  %v1176_v37 = vadd.f32 %v1794_v35, %v2277_v60  ;;  %v1131_v39 = vpop.f32.mrb[11].mxu0 }
 0x1aa   : > { %v1446_v38 = vadd.f32 %v2277_v60, %v1407_v36  ;;  %v1830_v40 = vpop.f32.mrb[10].mxu1  ;;  %1190 = vst.msk [vmem:[%s2282_s12 + $0x80] sm:$0xff] %vm1181_vm7, %v1173_v33  ;;  %v1174_v41 = vadd.f32 %v2277_v60, %v1131_v39 }
 0x1ab   : > { %1710 = vst.msk [vmem:[%s2282_s12 + $0xb0] sm:$0xff] %vm1181_vm7, %v1448_v34  ;;  %v1449_v42 = vadd.f32 %v1830_v40, %v2277_v60  ;;  %v1410_v43 = vpop.f32.mrb[11].mxu1  ;;  %1193 = vst.msk [vmem:[%s2282_s12 + $0xa8] sm:$0xff] %vm1181_vm7, %v1176_v37 }
 0x1ac   : > { %1708 = vst.msk [vmem:[%s2282_s12 + $0x90] sm:$0xff] %vm1181_vm7, %v1446_v38  ;;  %v1447_v44 = vadd.f32 %v2277_v60, %v1410_v43  ;;  %1191 = vst.msk [vmem:[%s2282_s12 + $0x88] sm:$0xff] %vm1181_vm7, %v1174_v41 }
 0x1ad   : > { %1711 = vst.msk [vmem:[%s2282_s12 + $0xb8] sm:$0xff] %vm1181_vm7, %v1449_v42 }
 0x1ae   : > { %1709 = vst.msk [vmem:[%s2282_s12 + $0x98] sm:$0xff] %vm1181_vm7, %v1447_v44  ;;  %v1797_v45 = vpop.f32.mrb[12].mxu0 }
 0x1af   : > { %v1179_v46 = vadd.f32 %v1797_v45, %v2277_v60  ;;  %v1144_v47 = vpop.f32.mrb[13].mxu0 }
 0x1b0   : > { %v1833_v48 = vpop.f32.mrb[12].mxu1  ;;  %v1177_v49 = vadd.f32 %v2277_v60, %v1144_v47  ;;  %v1798_v51 = vpop.f32.mrb[14].mxu0 }
 0x1b1   : > { %v1452_v50 = vadd.f32 %v1833_v48, %v2277_v60  ;;  %v1423_v52 = vpop.f32.mrb[13].mxu1  ;;  %1196 = vst.msk [vmem:[%s2282_s12 + $0xe0] sm:$0xff] %vm1181_vm7, %v1179_v46  ;;  %v1180_v53 = vadd.f32 %v1798_v51, %v2277_v60  ;;  %v1147_v55 = vpop.f32.mrb[15].mxu0 }
 0x1b2   : > { %v1450_v54 = vadd.f32 %v2277_v60, %v1423_v52  ;;  %v1834_v56 = vpop.f32.mrb[14].mxu1  ;;  %1194 = vst.msk [vmem:[%s2282_s12 + $0xc0] sm:$0xff] %vm1181_vm7, %v1177_v49  ;;  %v1178_v57 = vadd.f32 %v2277_v60, %v1147_v55 }
 0x1b3   : > { %1714 = vst.msk [vmem:[%s2282_s12 + $0xf0] sm:$0xff] %vm1181_vm7, %v1452_v50  ;;  %v1453_v58 = vadd.f32 %v1834_v56, %v2277_v60  ;;  %v1426_v59 = vpop.f32.mrb[15].mxu1  ;;  %1197 = vst.msk [vmem:[%s2282_s12 + $0xe8] sm:$0xff] %vm1181_vm7, %v1180_v53 }
 0x1b4   : > { %1712 = vst.msk [vmem:[%s2282_s12 + $0xd0] sm:$0xff] %vm1181_vm7, %v1450_v54  ;;  %v1451_v61 = vadd.f32 %v2277_v60, %v1426_v59  ;;  %1195 = vst.msk [vmem:[%s2282_s12 + $0xc8] sm:$0xff] %vm1181_vm7, %v1178_v57 }
 0x1b5   : > { %1715 = vst.msk [vmem:[%s2282_s12 + $0xf8] sm:$0xff] %vm1181_vm7, %v1453_v58 }
 0x1b6   : > { %1713 = vst.msk [vmem:[%s2282_s12 + $0xd8] sm:$0xff] %vm1181_vm7, %v1451_v61 }
 0x1b7 PF: > { %s14_s19 = sadd.s32 1, %s2008_s19   ;;  %s2401_s15 = smov %s2000_s17 }
 0x1b8   : > { %p11_p9 = scmp.ge.s32.totalorder %s14_s19, 6   ;;  %s2402_s16 = smov %s2004_s18 }
 0x1b9   : > { %s2403_s17 = smov %s2406_s20  ;;  %s2404_s18 = smov %s2410_s21 }
 0x1ba   :  { %13 = sbr.rel (!%p11_p9) target bundleno = 3 (0x3), region = 76 }

</bundles_post_ra>
